<compile_context>
chip_gen: v6e
topology: v6e:2x2x1
jax: 0.10.0
libtpu: 0.0.40
codegen_flags: <defaults>
</compile_context>

<pallas_src>
import functools

import jax
import jax.numpy as jnp
from jax.experimental import pallas as pl
from jax.experimental.pallas import tpu as pltpu


def _round_up(x, m):
    return ((x + m - 1) // m) * m


def _pick_act_dtype():
    """bf16 activation on v6e/v7x (native bf16 VPU/EUP); f32 elsewhere (v5e)."""
    try:
        kind = jax.devices()[0].device_kind.lower()
    except Exception:
        return jnp.float32
    if ("v6" in kind) or ("v7" in kind):
        return jnp.bfloat16
    return jnp.float32


def _s2_act_kernel(tg_ref, fgt_ref, x_ref, o_ref, *, act_dtype):
    # tg_ref  : [G, I]   bf16, resident across grid steps
    # fgt_ref : [I, G]   bf16, resident (pre-transposed in the wrapper)
    # x_ref   : [I, N]   activation block (bf16 or f32)
    # o_ref   : [I, N]   output block (f32)
    x = x_ref[...].astype(jnp.bfloat16)

    # to-grid projection: [G, I] @ [I, N] -> [G, N]  (MXU, f32 accumulate)
    x_grid = jnp.dot(tg_ref[...], x, preferred_element_type=jnp.float32)

    # SiLU, tanh form: silu(x) = 0.5*x*(1 + tanh(x/2))  -> single EUP op.
    xa = x_grid.astype(act_dtype)
    h = 0.5 * xa
    xa = h * (1.0 + jnp.tanh(h))

    # from-grid projection: [I, G] @ [G, N] -> [I, N]  (MXU)
    out = jnp.dot(fgt_ref[...], xa.astype(jnp.bfloat16),
                  preferred_element_type=jnp.float32)
    o_ref[...] = out.astype(o_ref.dtype)


def s2_activation(inputs, to_grid_mat, from_grid_mat, *, tzc=2048, act_dtype=None):
    """
    inputs        : [Z, I, C]   float32
    to_grid_mat   : [B, A, I]   float32   (SO3_grid.get_to_grid_mat)
    from_grid_mat : [B, A, I]   float32   (SO3_grid.get_from_grid_mat)
    returns       : [Z, I, C]   float32
    """
    Z, I, C = inputs.shape
    B, A, It = to_grid_mat.shape
    assert It == I and from_grid_mat.shape == (B, A, I)
    G = B * A

    if act_dtype is None:
        act_dtype = _pick_act_dtype()

    # Pre-cast / pre-transpose the (small, resident) grid matrices once.
    tg = to_grid_mat.reshape(G, I).astype(jnp.bfloat16)        # [G, I]
    fgt = from_grid_mat.reshape(G, I).T.astype(jnp.bfloat16)   # [I, G]

    kernel = functools.partial(_s2_act_kernel, act_dtype=act_dtype)

    # VMEM column budget: double-buffered I/O blocks + G-expanded intermediates.
    act_bytes = jnp.dtype(act_dtype).itemsize
    bytes_per_col = 12 * I + G * (6 + act_bytes)
    col_cap = max(128, (((20 * (1 << 20)) // bytes_per_col) // 128) * 128)

    if C % 128 == 0:
        # Zero-copy path: the "zic" split is expressed purely via BlockSpec
        # indexing (Z squeezed), no wrapper transpose / pad / extra HBM passes.
        tc = min(C, tzc, col_cap)
        tc = max(128, (tc // 128) * 128)
        while C % tc:
            tc -= 128
        grid = (Z, C // tc)

        cost = pl.CostEstimate(
            flops=4 * G * I * Z * C,
            transcendentals=G * Z * C,
            bytes_accessed=Z * I * C * (4 + 4) + 2 * G * I * 2,
        )
        return pl.pallas_call(
            kernel,
            out_shape=jax.ShapeDtypeStruct((Z, I, C), inputs.dtype),
            grid_spec=pltpu.PrefetchScalarGridSpec(
                num_scalar_prefetch=0,
                grid=grid,
                in_specs=[
                    pl.BlockSpec((G, I), lambda z, c: (0, 0)),        # to_grid (resident)
                    pl.BlockSpec((I, G), lambda z, c: (0, 0)),        # from_grid^T (resident)
                    pl.BlockSpec((None, I, tc), lambda z, c: (z, 0, c)),
                ],
                out_specs=pl.BlockSpec((None, I, tc), lambda z, c: (z, 0, c)),
            ),
            compiler_params=pltpu.CompilerParams(
                dimension_semantics=("parallel", "parallel"),
            ),
            cost_estimate=cost,
        )(tg, fgt, inputs)

    # Fused path: fold Z into the lane axis -> [I, Z*C] (lane-dense), bf16 input.
    # The transpose + pad + bf16 cast fuse into a single wrapper-side HBM copy.
    N = Z * C
    x2d = jnp.transpose(inputs, (1, 0, 2)).reshape(I, N).astype(jnp.bfloat16)

    n128 = _round_up(N, 128)
    tzc_eff = max(128, (min(tzc, col_cap) // 128) * 128)
    if n128 <= tzc_eff:
        # Keep grid_len >= 2 when possible so v7x's two TensorCores both get work.
        tzc_eff = n128 // 2 if (n128 % 256 == 0 and n128 >= 256) else n128
    n_pad = _round_up(n128, tzc_eff)
    if n_pad != N:
        x2d = jnp.pad(x2d, ((0, 0), (0, n_pad - N)))
    grid_len = n_pad // tzc_eff

    cost = pl.CostEstimate(
        flops=4 * G * I * n_pad,                 # two matmuls
        transcendentals=G * n_pad,               # one tanh per grid element
        bytes_accessed=I * n_pad * (2 + 4) + 2 * G * I * 2,   # bf16 in, f32 out, bf16 mats
    )

    out2d = pl.pallas_call(
        kernel,
        out_shape=jax.ShapeDtypeStruct((I, n_pad), inputs.dtype),
        grid_spec=pltpu.PrefetchScalarGridSpec(
            num_scalar_prefetch=0,
            grid=(grid_len,),
            in_specs=[
                pl.BlockSpec((G, I), lambda n: (0, 0)),        # to_grid (resident)
                pl.BlockSpec((I, G), lambda n: (0, 0)),        # from_grid^T (resident)
                pl.BlockSpec((I, tzc_eff), lambda n: (0, n)),  # fused-activation block
            ],
            out_specs=pl.BlockSpec((I, tzc_eff), lambda n: (0, n)),
        ),
        compiler_params=pltpu.CompilerParams(
            dimension_semantics=("parallel",),
        ),
        cost_estimate=cost,
    )(tg, fgt, x2d)

    # Undo the fusion/padding: [I, n_pad] -> [I, N] -> [Z, I, C]
    return out2d[:, :N].reshape(I, Z, C).transpose(1, 0, 2)


def s2_activation_ref(inputs, to_grid_mat, from_grid_mat):
    """Pure-JAX reference mirroring the PyTorch einsums."""
    x_grid = jnp.einsum('bai,zic->zbac', to_grid_mat, inputs)
    x_grid = x_grid * jax.nn.sigmoid(x_grid)          # SiLU
    return jnp.einsum('bai,zbac->zic', from_grid_mat, x_grid)


if __name__ == "__main__":
    # Small shapes consistent with the module:
    #   lmax = mmax = 3 -> I = (lmax+1)^2 = 16 spherical-harmonic coefficients
    #   SO(3) grid resolution B=8 (lat) x A=16 (lon) -> G=128 grid points
    lmax = 3
    I = (lmax + 1) ** 2      # 16
    B, A = 8, 16             # grid resolution
    key = jax.random.PRNGKey(0)
    k1, k2, k3 = jax.random.split(key, 3)
    to_grid_mat = jax.random.normal(k2, (B, A, I), dtype=jnp.float32) * 0.1
    from_grid_mat = jax.random.normal(k3, (B, A, I), dtype=jnp.float32) * 0.1

    # Exercise both layouts: C=32 -> fused Z*C path, C=128 -> zero-copy 2D-grid path.
    for (Z, C) in [(2, 32), (2, 128)]:
        kx = jax.random.fold_in(k1, C)
        inputs = jax.random.normal(kx, (Z, I, C), dtype=jnp.float32)

        out = s2_activation(inputs, to_grid_mat, from_grid_mat)
        out = jax.block_until_ready(out)

        ref = s2_activation_ref(inputs, to_grid_mat, from_grid_mat)
        assert out.shape == (Z, I, C)
        # bf16 MXU operands (+ bf16 activation on v6e/v7x) -> loosened tolerance.
        assert jnp.allclose(out, ref, atol=3e-2, rtol=3e-2), f"mismatch (Z={Z}, C={C})"

    print("KERNEL_OK")
</pallas_src>

<mosaic_0001>
module attributes {stable_mosaic.version = 11 : i64} {
  func.func @_s2_act_kernel(%arg0: i32, %arg1: memref<128x16xbf16, #tpu.memory_space<vmem>>, %arg2: memref<16x128xbf16, #tpu.memory_space<vmem>>, %arg3: memref<16x128xbf16, #tpu.memory_space<vmem>>, %arg4: memref<16x128xf32, #tpu.memory_space<vmem>>) attributes {dimension_semantics = [#tpu.dimension_semantics<parallel>], iteration_bounds = array<i64: 1>, scalar_prefetch = 0 : i64, scratch_operands = 0 : i64, tpu.core_type = #tpu.core_type<tc>, window_params = [{pipeline_mode = #tpu.pipeline_mode<synchronous>, transform_indices = @transform_0, window_bounds = array<i64: 128, 16>}, {pipeline_mode = #tpu.pipeline_mode<synchronous>, transform_indices = @transform_1, window_bounds = array<i64: 16, 128>}, {transform_indices = @transform_2, window_bounds = array<i64: 16, 128>}, {transform_indices = @transform_3, window_bounds = array<i64: 16, 128>}]} {
    %c0 = arith.constant 0 : index
    %c0_0 = arith.constant 0 : index
    %0 = vector.load %arg3[%c0, %c0_0] : memref<16x128xbf16, #tpu.memory_space<vmem>>, vector<16x128xbf16>
    %c0_1 = arith.constant 0 : index
    %c0_2 = arith.constant 0 : index
    %1 = vector.load %arg1[%c0_1, %c0_2] : memref<128x16xbf16, #tpu.memory_space<vmem>>, vector<128x16xbf16>
    %cst = arith.constant dense<0.000000e+00> : vector<128x128xf32>
    %2 = tpu.matmul %1, %0, %cst {dimension_numbers = #tpu.dot_dimension_numbers<[1], [0], [0], [1], [0, 0, 1, 1], [], []>} : vector<128x16xbf16>, vector<16x128xbf16>, vector<128x128xf32> -> vector<128x128xf32>
    %cst_3 = arith.constant 5.000000e-01 : f32
    %3 = vector.broadcast %cst_3 : f32 to vector<128x128xf32>
    %4 = arith.mulf %3, %2 : vector<128x128xf32>
    %5 = math.tanh %4 : vector<128x128xf32>
    %cst_4 = arith.constant 1.000000e+00 : f32
    %6 = vector.broadcast %cst_4 : f32 to vector<128x128xf32>
    %7 = arith.addf %6, %5 : vector<128x128xf32>
    %8 = arith.mulf %4, %7 : vector<128x128xf32>
    %c0_5 = arith.constant 0 : index
    %c0_6 = arith.constant 0 : index
    %9 = vector.load %arg2[%c0_5, %c0_6] : memref<16x128xbf16, #tpu.memory_space<vmem>>, vector<16x128xbf16>
    %10 = arith.truncf %8 : vector<128x128xf32> to vector<128x128xbf16>
    %cst_7 = arith.constant dense<0.000000e+00> : vector<16x128xf32>
    %11 = tpu.matmul %9, %10, %cst_7 {dimension_numbers = #tpu.dot_dimension_numbers<[1], [0], [0], [1], [0, 0, 1, 1], [], []>} : vector<16x128xbf16>, vector<128x128xbf16>, vector<16x128xf32> -> vector<16x128xf32>
    %c0_8 = arith.constant 0 : index
    %c0_9 = arith.constant 0 : index
    %12 = vector.load %arg4[%c0_8, %c0_9] : memref<16x128xf32, #tpu.memory_space<vmem>>, vector<16x128xf32>
    tpu.vector_store %arg4[%c0_8, %c0_9], %11 {strides = array<i32>} : memref<16x128xf32, #tpu.memory_space<vmem>>, vector<16x128xf32>,
    return
  }
  func.func @transform_0(%arg0: i32) -> (i32, i32) {
    %c0_i32 = arith.constant 0 : i32
    %c0_i32_0 = arith.constant 0 : i32
    %c0_i32_1 = arith.constant 0 : i32
    return %c0_i32, %c0_i32_0 : i32, i32
  }
  func.func @transform_1(%arg0: i32) -> (i32, i32) {
    %c0_i32 = arith.constant 0 : i32
    %c0_i32_0 = arith.constant 0 : i32
    %c0_i32_1 = arith.constant 0 : i32
    return %c0_i32, %c0_i32_0 : i32, i32
  }
  func.func @transform_2(%arg0: i32) -> (i32, i32) {
    %c0_i32 = arith.constant 0 : i32
    %c0_i32_0 = arith.constant 0 : i32
    return %c0_i32, %arg0 : i32, i32
  }
  func.func @transform_3(%arg0: i32) -> (i32, i32) {
    %c0_i32 = arith.constant 0 : i32
    %c0_i32_0 = arith.constant 0 : i32
    return %c0_i32, %arg0 : i32, i32
  }
}

</mosaic_0001>

<bundles_post_ra>
// kernel: tpu_custom_call.1
= control target key start
LH: loop header
LB: loop body
LE: loop exit
PB: predicated region body
PF: predicated region fallthrough
CT: control target
= control target key end

     0   :  { %vm80_vm0 = vcmask 130048   ;;  %s567_s0 = inlined_call_operand.vmem [shape: bf16[128,16], index: 0, kind: input, shape index: {}]   ;;  %s568_s1 = inlined_call_operand.vmem [shape: bf16[16,128], index: 1, kind: input, shape index: {}]   ;;  %s569_s2 = inlined_call_operand.vmem [shape: bf16[16,128], index: 2, kind: input, shape index: {}]   ;;  %s570_s3 = inlined_call_operand.hbm [shape: f32[16,128], index: 3, kind: output, shape index: {}]  }
   0x1   :  { %v420_v0 = vld [vmem:[%s569_s2] sm:$0xff]   ;;  %v422_v2 = vld [vmem:[%s567_s0 + $0x8] sm:$0xff]   ;;  %v423_v3 = vld [vmem:[%s567_s0 + $0x10] sm:$0xff]  }
   0x2   :  { %v421_v1 = vld [vmem:[%s567_s0] sm:$0xff]   ;;  %377 = vmatprep.subr.bf16.mxu0 %v420_v0 }
   0x3   :  { %378 = vmatpush3.bf16.msra.mxu0 %v420_v0  ;;  %379 = vmatprep.mubr.msk.bf16.mxu0 %vm80_vm0, %v421_v1 }
   0x6   :  { %380 = vmatmul.mubr.msk.bf16.vlgmr.msra.gmra.mxu0 %vm80_vm0, %v422_v2 }
   0x7   :  { %383 = vmatprep.mubr.msk.bf16.mxu0 %vm80_vm0, %v423_v3 }
   0x8   :  { %8 = vsyncpa [#allocation3], 0  ;;  %v424_v4 = vld [vmem:[%s567_s0 + $0x18] sm:$0xff]   ;;  %v425_v5 = vld [vmem:[%s567_s0 + $0x20] sm:$0xff]   ;;  %v484_v9 = vmov 0.0   ;;  %vm485_vm1 = vmmov 0  }
   0x9   :  { %v426_v6 = vld [vmem:[%s567_s0 + $0x28] sm:$0xff]   ;;  %v427_v7 = vld [vmem:[%s567_s0 + $0x30] sm:$0xff]   ;;  %v428_v8 = vld [vmem:[%s567_s0 + $0x38] sm:$0xff]   ;;  %395 = vmatprep.subr.bf16.mxu1 %v484_v9  ;;  %411 = vmatprep.mubr.msk.bf16.mxu1 %vm485_vm1, %v484_v9  ;;  %s486_s30 = smov [#allocation2]  }
   0xa   :  { %s330_s4 = sshll.u32 %s486_s30, 4  ;;  %s331_s4 = int_to_ptr.vmem [resolvable:$true] %s330_s4 }
   0xb   :  { %s462_s5 = scalar_lea.vmem %s331_s4, 256  ;;  %p467_p1 = scmp.lt.s32.totalorder %s331_s4, %s331_s4 }
   0xc   :  { %p463_p0 = scmp.ne.s32.totalorder %s331_s4, %s462_s5  ;;  %p468_p2 = scmp.lt.s32.totalorder %s462_s5, %s462_s5 }
   0xe   :  { %384 = vmatmul.mubr.msk.bf16.gmra.mxu0 %vm80_vm0, %v424_v4  ;;  %p469_p3 = por %p468_p2, %p467_p1 }
   0xf   :  { %387 = vmatprep.mubr.msk.bf16.mxu0 %vm80_vm0, %v425_v5 }
  0x10   :  { %p470_p4 = pnand %p469_p3, %p463_p0 }
  0x16   :  { %388 = vmatmul.mubr.msk.bf16.gmra.mxu0 %vm80_vm0, %v426_v6 }
  0x17   :  { %391 = vmatprep.mubr.msk.bf16.mxu0 %vm80_vm0, %v427_v7 }
  0x1e   :  { %392 = vmatmul.mubr.msk.bf16.gmra.mxu0 %vm80_vm0, %v428_v8 }
  0xc6   :  { %v381_v10 = vpop.f32.mrf.mxu0 }
  0xc7   :  { %v204_v46 = vmul.f32 0.5, %v381_v10 }
  0xc8   :  { %v139_v11 = vpop.f32.mrf.mxu0 }
  0xc9   :  { %v202_v57 = vmul.f32 0.5, %v139_v11 }
  0xca   :  { %v382_v12 = vpop.f32.mrf.mxu0 }
  0xcb   :  { %v548_v42 = vmul.f32 0.5, %v382_v12 }
  0xcc   :  { %v142_v13 = vpop.f32.mrf.mxu0 }
  0xcd   :  { %v203_v52 = vmul.f32 0.5, %v142_v13 }
  0xce   :  { %v385_v14 = vpop.f32.mrf.mxu0 }
  0xcf   :  { %v208_v35 = vmul.f32 0.5, %v385_v14 }
  0xd0   :  { %v155_v15 = vpop.f32.mrf.mxu0 }
  0xd1   :  { %v546_v38 = vmul.f32 0.5, %v155_v15 }
  0xd2   :  { %v386_v16 = vpop.f32.mrf.mxu0 }
  0xd3   :  { %v209_v34 = vmul.f32 0.5, %v386_v16 }
  0xd4   :  { %v158_v17 = vpop.f32.mrf.mxu0 }
  0xd5   :  { %v207_v37 = vmul.f32 0.5, %v158_v17 }
  0xd6   :  { %v389_v18 = vpop.f32.mrf.mxu0 }
  0xd7   :  { %v212_v30 = vmul.f32 0.5, %v389_v18 }
  0xd8   :  { %v171_v19 = vpop.f32.mrf.mxu0 }
  0xd9   :  { %v210_v33 = vmul.f32 0.5, %v171_v19 }
  0xda   :  { %v390_v20 = vpop.f32.mrf.mxu0 }
  0xdb   :  { %v213_v26 = vmul.f32 0.5, %v390_v20 }
  0xdc   :  { %v174_v21 = vpop.f32.mrf.mxu0 }
  0xdd   :  { %v211_v32 = vmul.f32 0.5, %v174_v21 }
  0xde   :  { %v393_v22 = vpop.f32.mrf.mxu0 }
  0xdf   :  { %v216_v23 = vmul.f32 0.5, %v393_v22 }
  0xe0   :  { %v187_v24 = vpop.f32.mrf.mxu0 }
  0xe1   :  { %430 = vtanh.f32 %v216_v23  ;;  %v214_v25 = vmul.f32 0.5, %v187_v24 }
  0xe2   :  { %v394_v27 = vpop.f32.mrf.mxu0 }
  0xe3   :  { %v217_v28 = vmul.f32 0.5, %v394_v27  ;;  %432 = vtanh.f32 %v214_v25 }
  0xe4   :  { %v190_v29 = vpop.f32.mrf.mxu0 }
  0xe5   :  { %434 = vtanh.f32 %v217_v28  ;;  %v215_v31 = vmul.f32 0.5, %v190_v29 }
  0xe6   :  { %436 = vtanh.f32 %v213_v26 }
  0xe7   :  { %438 = vtanh.f32 %v215_v31 }
  0xe8   :  { %440 = vtanh.f32 %v212_v30 }
  0xe9   :  { %442 = vtanh.f32 %v211_v32 }
  0xea   :  { %444 = vtanh.f32 %v210_v33 }
  0xeb   :  { %446 = vtanh.f32 %v209_v34 }
  0xec   :  { %448 = vtanh.f32 %v208_v35 }
  0xed   :  { %450 = vtanh.f32 %v207_v37 }
  0xee   :  { %v431_v36 = vpop.eup %430  ;;  %452 = vtanh.f32 %v546_v38 }
  0xef   :  { %v248_v40 = vadd.f32 1.0, %v431_v36  ;;  %454 = vtanh.f32 %v548_v42 }
  0xf0   :  { %v433_v39 = vpop.eup %432  ;;  %456 = vtanh.f32 %v204_v46 }
  0xf1   :  { %v264_v47 = vmul.f32 %v248_v40, %v216_v23  ;;  %v246_v48 = vadd.f32 1.0, %v433_v39  ;;  %458 = vtanh.f32 %v203_v52 }
  0xf2   :  { %v435_v41 = vpop.eup %434  ;;  %460 = vtanh.f32 %v202_v57 }
  0xf3   :  { %v437_v43 = vpop.eup %436  ;;  %v249_v44 = vadd.f32 1.0, %v435_v41  ;;  %v262_v59 = vmul.f32 %v246_v48, %v214_v25 }
  0xf4   :  { %v439_v45 = vpop.eup %438  ;;  %v245_v53 = vadd.f32 1.0, %v437_v43 }
  0xf5   :  { %v265_v49 = vmul.f32 %v249_v44, %v217_v28  ;;  %v247_v50 = vadd.f32 1.0, %v439_v45  ;;  %v441_v51 = vpop.eup %440 }
  0xf6   :  { %v443_v56 = vpop.eup %442  ;;  %v244_v58 = vadd.f32 1.0, %v441_v51  ;;  %v261_v61 = vmul.f32 %v245_v53, %v213_v26 }
  0xf7   :  { %v263_v54 = vmul.f32 %v247_v50, %v215_v31  ;;  %v275_v55 = vpack.c.bf16 %v265_v49, %v264_v47  ;;  %v445_v60 = vpop.eup %444  ;;  %v243_v62 = vadd.f32 1.0, %v443_v56 }
  0xf8   :  { %v447_v0 = vpop.eup %446  ;;  %v260_v1 = vmul.f32 %v244_v58, %v212_v30  ;;  %v242_v2 = vadd.f32 1.0, %v445_v60 }
  0xf9   :  { %396 = vmatpush3.bf16.msra.mxu1 %v275_v55  ;;  %v274_v63 = vpack.c.bf16 %v263_v54, %v262_v59  ;;  %v449_v3 = vpop.eup %448  ;;  %v241_v4 = vadd.f32 1.0, %v447_v0  ;;  %v259_v5 = vmul.f32 %v243_v62, %v211_v32 }
  0xfa   :  { %397 = vmatprep.subr.bf16.mxu1 %v484_v9  ;;  %v273_v6 = vpack.c.bf16 %v261_v61, %v260_v1  ;;  %v451_v7 = vpop.eup %450  ;;  %v240_v10 = vadd.f32 1.0, %v449_v3  ;;  %v258_v11 = vmul.f32 %v242_v2, %v210_v33 }
  0xfb   :  { %v453_v8 = vpop.eup %452  ;;  %v257_v13 = vmul.f32 %v241_v4, %v209_v34  ;;  %v239_v14 = vadd.f32 1.0, %v451_v7 }
  0xfc   :  { %v455_v12 = vpop.eup %454  ;;  %v272_v15 = vpack.c.bf16 %v259_v5, %v258_v11  ;;  %v256_v16 = vmul.f32 %v240_v10, %v208_v35  ;;  %v238_v17 = vadd.f32 1.0, %v453_v8  ;;  %v429_v35 = vld [vmem:[%s568_s1] sm:$0xff]  }
  0xfd   :  { %398 = vmatpush3.bf16.msra.mxu1 %v274_v63  ;;  %v457_v18 = vpop.eup %456  ;;  %v237_v19 = vadd.f32 1.0, %v455_v12  ;;  %v255_v20 = vmul.f32 %v239_v14, %v207_v37 }
  0xfe   :  { %399 = vmatprep.subr.bf16.mxu1 %v484_v9  ;;  %v271_v21 = vpack.c.bf16 %v257_v13, %v256_v16  ;;  %v459_v22 = vpop.eup %458  ;;  %v236_v23 = vadd.f32 1.0, %v457_v18  ;;  %v254_v24 = vmul.f32 %v238_v17, %v546_v38 }
  0xff   :  { %v461_v25 = vpop.eup %460  ;;  %v253_v26 = vmul.f32 %v237_v19, %v548_v42  ;;  %v235_v27 = vadd.f32 1.0, %v459_v22 }
 0x100   :  { %v270_v28 = vpack.c.bf16 %v255_v20, %v254_v24  ;;  %v252_v29 = vmul.f32 %v236_v23, %v204_v46  ;;  %v234_v30 = vadd.f32 1.0, %v461_v25 }
 0x101   :  { %400 = vmatpush3.bf16.msra.mxu1 %v273_v6  ;;  %v251_v31 = vmul.f32 %v235_v27, %v203_v52 }
 0x102   :  { %401 = vmatprep.subr.bf16.mxu1 %v484_v9  ;;  %v269_v32 = vpack.c.bf16 %v253_v26, %v252_v29  ;;  %v250_v33 = vmul.f32 %v234_v30, %v202_v57 }
 0x104   :  { %v268_v34 = vpack.c.bf16 %v251_v31, %v250_v33 }
 0x105   :  { %402 = vmatpush3.bf16.msra.mxu1 %v272_v15 }
 0x106   :  { %403 = vmatprep.subr.bf16.mxu1 %v484_v9 }
 0x109   :  { %404 = vmatpush3.bf16.msra.mxu1 %v271_v21 }
 0x10a   :  { %405 = vmatprep.subr.bf16.mxu1 %v484_v9 }
 0x10d   :  { %406 = vmatpush3.bf16.msra.mxu1 %v270_v28 }
 0x10e   :  { %407 = vmatprep.subr.bf16.mxu1 %v484_v9 }
 0x111   :  { %408 = vmatpush3.bf16.msra.mxu1 %v269_v32 }
 0x112   :  { %409 = vmatprep.subr.bf16.mxu1 %v484_v9 }
 0x115   :  { %410 = vmatpush3.bf16.msra.mxu1 %v268_v34 }
 0x118   :  { %412 = vmatmul.mubr.bf16.vlgmr.msra.gmra.mxu1 %v429_v35 }
 0x1d8   :  { %v316_v36 = vpop.f32.mrf.mxu1 }
 0x1d9   :  { %323 = vst [vmem:[#allocation2] sm:$0xff] %v316_v36 }
 0x1da   :  { %v413_v37 = vpop.f32.mrf.mxu1 }
 0x1dc   :  { %v319_v38 = vpop.f32.mrf.mxu1 }
 0x1dd   :  { %324 = vst [vmem:[#allocation2 + $0x8] sm:$0xff] %v319_v38 }
 0x1de   :  { %v414_v39 = vpop.f32.mrf.mxu1 }
 0x1df   :  { %473 = shalt.err (!%p470_p4)
}
 0x1e0   :  { %s487_s6 = smov 128   ;;  %s488_s1 = smov 8  }
 0x1e1   :  { %336 = dma.vmem_to_hbm [thread:$0]  %s331_s4, 256, %s570_s3, [#allocation3], %s487_s6, %s487_s6, %s488_s1  }
 0x1e2   :  { %482 = dma.done.wait [#allocation3], 256  }
 0x1e3   :  { %483 = vsyncadd [#allocation3], 4294967040 }
 0x1e4   :  { %340 = vsyncpa [#allocation3], 1 }

</bundles_post_ra>
